<compile_context>
chip_gen: v7x
topology: tpu7x:2x2x1
jax: 0.10.0
libtpu: 0.0.40
codegen_flags: <defaults>
</compile_context>

<pallas_src>
import jax
import jax.numpy as jnp
from jax import lax
from jax.experimental import pallas as pl
from jax.experimental.pallas import tpu as pltpu

EPS = 1e-5
MOMENTUM = 0.9

_VMEM_LIMIT = 32 * 1024 * 1024          # explicit scoped-VMEM limit (safe on v5e/v6e/v7x)
_MAX_TILE_BYTES = 2 * 1024 * 1024       # streaming tile budget (lane-aligned case)
_MAX_TILE_BYTES_UNALIGNED = 512 * 1024  # budget when the lane axis can't be 128-tiled
_MAX_HW_TILE = 4096                     # cap on the lane-axis tile (keeps inner fold short)
_STATS_CHUNK = 128                      # inner ref-slice width, stats pass
_APPLY_CHUNK = 256                      # inner ref-slice width, apply pass / fused kernel
_FUSE_MAX_BYTES = 1 * 1024 * 1024       # x smaller than this -> single fused kernel
_PAD_UNIT = 1024                        # lane padding unit for big misaligned H*W


# ----------------------------------------------------------------------------
# small static helpers
# ----------------------------------------------------------------------------
def _largest_div(n, cap, multiple):
    """Largest d dividing n with d <= cap and d % multiple == 0 (or None)."""
    d = (min(cap, n) // multiple) * multiple
    while d >= multiple:
        if n % d == 0:
            return d
        d -= multiple
    return None


def _pick_chunk(width, cap):
    """Largest multiple of 128 that divides `width` and is <= cap (width % 128 == 0)."""
    c = (min(width, cap) // 128) * 128
    while width % c != 0:
        c -= 128
    return c


def _pick_row_block(rows, hw_tile, itemsize, budget):
    """Sublane-axis tile: multiple of the dtype packing, sized for `budget` bytes."""
    pack = max(8, 32 // max(1, itemsize))            # f32:8  bf16:16  int8:32
    target = max(pack, budget // max(1, hw_tile * itemsize))
    if rows >= 2 * pack:
        target = min(target, rows // 2)              # >=2 row blocks -> both v7x TCs busy
    for m in (pack, 8):
        if rows % m == 0:
            d = _largest_div(rows, max(target, m), m)
            if d is not None:
                return d
    return rows                                      # odd row count: single full-dim block


# ----------------------------------------------------------------------------
# kernels
# ----------------------------------------------------------------------------
def _make_stats_kernel(chunk, k):
    """Per-row sum / sum-of-squares, streamed over the HW grid axis."""
    u = max(1, min(k, 4))

    def kernel(x_ref, sums_ref, acc_s_ref, acc_q_ref):
        h = pl.program_id(1)

        @pl.when(h == 0)
        def _init():
            acc_s_ref[...] = jnp.zeros_like(acc_s_ref)
            acc_q_ref[...] = jnp.zeros_like(acc_q_ref)

        if k == 1:
            sl = x_ref[...].astype(jnp.float32)
            acc_s_ref[...] += sl
            acc_q_ref[...] += sl * sl
        else:
            def body(i, carry):
                s, q = carry
                start = pl.multiple_of(i * chunk, 128)
                sl = x_ref[:, pl.ds(start, chunk)].astype(jnp.float32)
                return s + sl, q + sl * sl

            s, q = lax.fori_loop(0, k, body,
                                 (acc_s_ref[...], acc_q_ref[...]), unroll=u)
            acc_s_ref[...] = s
            acc_q_ref[...] = q

        @pl.when(h == pl.num_programs(1) - 1)
        def _finalize():                              # one lane reduce per row block
            sums_ref[:, 0:1] = jnp.sum(acc_s_ref[...], axis=1, keepdims=True)
            sums_ref[:, 1:2] = jnp.sum(acc_q_ref[...], axis=1, keepdims=True)

    return kernel


def _make_apply_kernel(chunk, k):
    """y = x * scale + bias, scale/bias packed into one (r_block, 2) input."""
    u = max(1, min(k, 8))

    def kernel(x_ref, sb_ref, y_ref):
        sb = sb_ref[...]
        scale = sb[:, 0:1]
        bias = sb[:, 1:2]
        if k == 1:
            x = x_ref[...].astype(jnp.float32)
            y_ref[...] = (x * scale + bias).astype(y_ref.dtype)
        else:
            def body(i, _):
                start = pl.multiple_of(i * chunk, 128)
                sl = x_ref[:, pl.ds(start, chunk)].astype(jnp.float32)
                y_ref[:, pl.ds(start, chunk)] = (sl * scale + bias).astype(y_ref.dtype)
                return 0

            lax.fori_loop(0, k, body, 0, unroll=u)

    return kernel


def _make_fused_kernel(n, hw, chunk, k, eps):
    """Single-call BN: stats + channel fold + normalization, x stays in VMEM."""
    m = float(n * hw)
    u = max(1, min(k, 8))

    def kernel(x_ref, gamma_ref, beta_ref, y_ref, mean_ref, var_ref):
        c = gamma_ref.shape[0]

        def accum(start, s, q):
            for nn in range(n):                       # static unroll over batch (n small)
                sl = x_ref[nn, :, pl.ds(start, chunk)].astype(jnp.float32)  # (C, chunk)
                s = s + sl
                q = q + sl * sl
            return s, q

        z = jnp.zeros((c, chunk), jnp.float32)
        if k == 1:
            s, q = accum(0, z, z)
        else:
            def body(j, carry):
                return accum(pl.multiple_of(j * chunk, 128), *carry)

            s, q = lax.fori_loop(0, k, body, (z, z), unroll=u)

        mean = jnp.sum(s, axis=1, keepdims=True) / m                  # (C, 1)
        var = jnp.maximum(jnp.sum(q, axis=1, keepdims=True) / m - mean * mean, 0.0)
        scale = gamma_ref[...].astype(jnp.float32) * lax.rsqrt(var + eps)
        bias = beta_ref[...].astype(jnp.float32) - mean * scale
        mean_ref[...] = mean
        var_ref[...] = var

        def apply_chunk(start):
            for nn in range(n):
                sl = x_ref[nn, :, pl.ds(start, chunk)].astype(jnp.float32)
                y_ref[nn, :, pl.ds(start, chunk)] = (sl * scale + bias).astype(y_ref.dtype)

        if k == 1:
            apply_chunk(0)
        else:
            def body2(j, _):
                apply_chunk(pl.multiple_of(j * chunk, 128))
                return 0

            lax.fori_loop(0, k, body2, 0, unroll=u)

    return kernel


# ----------------------------------------------------------------------------
# wrappers
# ----------------------------------------------------------------------------
def _bn_fused(x, gamma, beta):
    N, C, H, W = x.shape
    HW = H * W
    x3 = x.reshape(N, C, HW)
    chunk = _pick_chunk(HW, _APPLY_CHUNK) if HW % 128 == 0 else HW
    k = HW // chunk

    y3, mean, var = pl.pallas_call(
        _make_fused_kernel(N, HW, chunk, k, EPS),
        out_shape=(
            jax.ShapeDtypeStruct((N, C, HW), x.dtype),
            jax.ShapeDtypeStruct((C, 1), jnp.float32),
            jax.ShapeDtypeStruct((C, 1), jnp.float32),
        ),
        compiler_params=pltpu.CompilerParams(vmem_limit_bytes=_VMEM_LIMIT),
    )(x3, gamma.reshape(C, 1), beta.reshape(C, 1))
    return y3.reshape(N, C, H, W), mean[:, 0], var[:, 0]


def _bn_streaming(x, gamma, beta):
    N, C, H, W = x.shape
    HW = H * W
    R = N * C
    M = N * HW                                       # true element count per channel
    x2 = x.reshape(R, HW)                            # free reshape, no transpose
    itemsize = x2.dtype.itemsize

    # Lane-misaligned & large HW: pad the lane axis once so tiles stay bounded
    # (a full-HW block would not fit / double-buffer in v7x's 64 MiB VMEM).
    hw_p = HW
    if HW % 128 != 0 and HW * itemsize * 8 > _MAX_TILE_BYTES_UNALIGNED:
        hw_p = pl.cdiv(HW, _PAD_UNIT) * _PAD_UNIT
        x2 = jnp.pad(x2, ((0, 0), (0, hw_p - HW)))   # zeros: no effect on sums

    if hw_p % 128 == 0:
        hw_tile = _largest_div(hw_p, _MAX_HW_TILE, 128)
        budget = _MAX_TILE_BYTES
    else:
        hw_tile = hw_p                               # small odd HW: one full-width block
        budget = _MAX_TILE_BYTES_UNALIGNED

    r_block = _pick_row_block(R, hw_tile, itemsize, budget)
    grid = (R // r_block, hw_p // hw_tile)

    stats_chunk = _pick_chunk(hw_tile, _STATS_CHUNK) if hw_tile % 128 == 0 else hw_tile
    apply_chunk = _pick_chunk(hw_tile, _APPLY_CHUNK) if hw_tile % 128 == 0 else hw_tile

    # Pass 1: per-row sum + sum of squares, packed into one (R, 2) output.
    row_sums = pl.pallas_call(
        _make_stats_kernel(stats_chunk, hw_tile // stats_chunk),
        grid=grid,
        in_specs=[pl.BlockSpec((r_block, hw_tile), lambda r, h: (r, h))],
        out_specs=pl.BlockSpec((r_block, 2), lambda r, h: (r, 0)),
        out_shape=jax.ShapeDtypeStruct((R, 2), jnp.float32),
        scratch_shapes=[
            pltpu.VMEM((r_block, stats_chunk), jnp.float32),
            pltpu.VMEM((r_block, stats_chunk), jnp.float32),
        ],
        compiler_params=pltpu.CompilerParams(
            dimension_semantics=("parallel", "arbitrary"),
            vmem_limit_bytes=_VMEM_LIMIT),
    )(x2)

    # Tiny per-channel epilogue: fold rows -> channels, build folded scale/bias.
    ch = row_sums.reshape(N, C, 2).sum(axis=0)                 # (C, 2)
    mean = ch[:, 0] / M
    var = jnp.maximum(ch[:, 1] / M - mean * mean, 0.0)         # biased var (matches spec)
    scale_c = gamma.reshape(C).astype(jnp.float32) * lax.rsqrt(var + EPS)
    bias_c = beta.reshape(C).astype(jnp.float32) - mean * scale_c
    sb_c = jnp.stack([scale_c, bias_c], axis=-1)               # (C, 2)
    sb_rows = jnp.broadcast_to(sb_c[None], (N, C, 2)).reshape(R, 2)

    # Pass 2: y = x * scale + bias (one multiply-add per element, lane-dense).
    y2 = pl.pallas_call(
        _make_apply_kernel(apply_chunk, hw_tile // apply_chunk),
        grid=grid,
        in_specs=[
            pl.BlockSpec((r_block, hw_tile), lambda r, h: (r, h)),
            pl.BlockSpec((r_block, 2), lambda r, h: (r, 0)),
        ],
        out_specs=pl.BlockSpec((r_block, hw_tile), lambda r, h: (r, h)),
        out_shape=jax.ShapeDtypeStruct((R, hw_p), x.dtype),
        compiler_params=pltpu.CompilerParams(
            dimension_semantics=("parallel", "parallel"),
            vmem_limit_bytes=_VMEM_LIMIT),
    )(x2, sb_rows)

    if hw_p != HW:
        y2 = y2[:, :HW]
    return y2.reshape(N, C, H, W), mean, var


def batch_norm_forward(x, gamma, beta, moving_mean, moving_var):
    """Training-mode BatchNorm forward (matches the torch reference's batch_norm).

    x: (N, C, H, W); gamma/beta/moving_mean/moving_var: (1, C, 1, 1).
    Returns (y, new_moving_mean, new_moving_var).
    """
    # TODO(synk): inference branch (is_training=False) not implemented; the
    # module's forward runs in training mode by default.
    N, C, H, W = x.shape
    x_bytes = x.size * x.dtype.itemsize

    if x_bytes <= _FUSE_MAX_BYTES and N <= 128:
        y, mean, var = _bn_fused(x, gamma, beta)
    else:
        y, mean, var = _bn_streaming(x, gamma, beta)

    mean4 = mean.reshape(1, C, 1, 1).astype(moving_mean.dtype)
    var4 = var.reshape(1, C, 1, 1).astype(moving_var.dtype)
    new_mm = MOMENTUM * moving_mean + (1.0 - MOMENTUM) * mean4
    new_mv = MOMENTUM * moving_var + (1.0 - MOMENTUM) * var4
    return y, new_mm, new_mv


# ----------------------------------------------------------------------------
# self-test
# ----------------------------------------------------------------------------
if __name__ == "__main__":
    bn_fn = jax.jit(batch_norm_forward)

    def check(N, C, H, W, key):
        gamma = jnp.ones((1, C, 1, 1), jnp.float32)       # nn.Parameter(torch.ones)
        beta = jnp.zeros((1, C, 1, 1), jnp.float32)       # nn.Parameter(torch.zeros)
        mm = jnp.zeros((1, C, 1, 1), jnp.float32)
        mv = jnp.zeros((1, C, 1, 1), jnp.float32)
        x = jax.random.uniform(key, (N, C, H, W), dtype=jnp.float32)  # ~ torch.rand

        y, new_mm, new_mv = bn_fn(x, gamma, beta, mm, mv)
        jax.block_until_ready((y, new_mm, new_mv))

        mean_ref = jnp.mean(x, axis=(0, 2, 3), keepdims=True)
        var_ref = jnp.mean((x - mean_ref) ** 2, axis=(0, 2, 3), keepdims=True)
        y_ref = gamma * (x - mean_ref) / jnp.sqrt(var_ref + EPS) + beta
        assert jnp.allclose(y, y_ref, atol=2e-3, rtol=2e-3), "y mismatch"
        assert jnp.allclose(new_mm, MOMENTUM * mm + (1 - MOMENTUM) * mean_ref,
                            atol=1e-4), "moving_mean mismatch"
        assert jnp.allclose(new_mv, MOMENTUM * mv + (1 - MOMENTUM) * var_ref,
                            atol=1e-4), "moving_var mismatch"

    key = jax.random.PRNGKey(0)
    k1, k2 = jax.random.split(key)
    check(2, 4, 16, 16, k1)       # small input  -> fused single-kernel path
    check(8, 32, 128, 128, k2)    # larger input -> two-pass streaming path

    print("KERNEL_OK")
</pallas_src>

<mosaic_0001>
module attributes {stable_mosaic.version = 11 : i64} {
  func.func @kernel(%arg0: memref<2x4x256xf32, #tpu.memory_space<vmem>>, %arg1: memref<4x1xf32, #tpu.memory_space<vmem>>, %arg2: memref<4x1xf32, #tpu.memory_space<vmem>>, %arg3: memref<2x4x256xf32, #tpu.memory_space<vmem>>, %arg4: memref<4x1xf32, #tpu.memory_space<vmem>>, %arg5: memref<4x1xf32, #tpu.memory_space<vmem>>) attributes {dimension_semantics = [], scalar_prefetch = 0 : i64, scratch_operands = 0 : i64, tpu.core_type = #tpu.core_type<tc>} {
    %cst = arith.constant 0.000000e+00 : f32
    %0 = vector.broadcast %cst : f32 to vector<4x256xf32>
    %c0 = arith.constant 0 : index
    %c0_0 = arith.constant 0 : index
    %c0_1 = arith.constant 0 : index
    %1 = vector.load %arg0[%c0, %c0_0, %c0_1] : memref<2x4x256xf32, #tpu.memory_space<vmem>>, vector<1x4x256xf32>
    %2 = vector.shape_cast %1 : vector<1x4x256xf32> to vector<4x256xf32>
    %3 = arith.addf %0, %2 : vector<4x256xf32>
    %4 = arith.mulf %2, %2 : vector<4x256xf32>
    %5 = arith.addf %0, %4 : vector<4x256xf32>
    %c1 = arith.constant 1 : index
    %c0_2 = arith.constant 0 : index
    %c0_3 = arith.constant 0 : index
    %6 = vector.load %arg0[%c1, %c0_2, %c0_3] : memref<2x4x256xf32, #tpu.memory_space<vmem>>, vector<1x4x256xf32>
    %7 = vector.shape_cast %6 : vector<1x4x256xf32> to vector<4x256xf32>
    %8 = arith.addf %3, %7 : vector<4x256xf32>
    %9 = arith.mulf %7, %7 : vector<4x256xf32>
    %10 = arith.addf %5, %9 : vector<4x256xf32>
    %cst_4 = arith.constant dense<0.000000e+00> : vector<4xf32>
    %11 = vector.multi_reduction <add>, %8, %cst_4 [1] : vector<4x256xf32> to vector<4xf32>
    %12 = vector.shape_cast %11 : vector<4xf32> to vector<4x1xf32>
    %cst_5 = arith.constant 5.120000e+02 : f32
    %13 = vector.broadcast %cst_5 : f32 to vector<4x1xf32>
    %14 = arith.divf %12, %13 : vector<4x1xf32>
    %cst_6 = arith.constant dense<0.000000e+00> : vector<4xf32>
    %15 = vector.multi_reduction <add>, %10, %cst_6 [1] : vector<4x256xf32> to vector<4xf32>
    %16 = vector.shape_cast %15 : vector<4xf32> to vector<4x1xf32>
    %cst_7 = arith.constant 5.120000e+02 : f32
    %17 = vector.broadcast %cst_7 : f32 to vector<4x1xf32>
    %18 = arith.divf %16, %17 : vector<4x1xf32>
    %19 = arith.mulf %14, %14 : vector<4x1xf32>
    %20 = arith.subf %18, %19 : vector<4x1xf32>
    %cst_8 = arith.constant 0.000000e+00 : f32
    %21 = vector.broadcast %cst_8 : f32 to vector<4x1xf32>
    %22 = arith.maximumf %20, %21 : vector<4x1xf32>
    %c0_9 = arith.constant 0 : index
    %c0_10 = arith.constant 0 : index
    %23 = vector.load %arg1[%c0_9, %c0_10] : memref<4x1xf32, #tpu.memory_space<vmem>>, vector<4x1xf32>
    %cst_11 = arith.constant 9.99999974E-6 : f32
    %24 = vector.broadcast %cst_11 : f32 to vector<4x1xf32>
    %25 = arith.addf %22, %24 : vector<4x1xf32>
    %26 = math.rsqrt %25 : vector<4x1xf32>
    %27 = arith.mulf %23, %26 : vector<4x1xf32>
    %c0_12 = arith.constant 0 : index
    %c0_13 = arith.constant 0 : index
    %28 = vector.load %arg2[%c0_12, %c0_13] : memref<4x1xf32, #tpu.memory_space<vmem>>, vector<4x1xf32>
    %29 = arith.mulf %14, %27 : vector<4x1xf32>
    %30 = arith.subf %28, %29 : vector<4x1xf32>
    %c0_14 = arith.constant 0 : index
    %c0_15 = arith.constant 0 : index
    %31 = vector.load %arg4[%c0_14, %c0_15] : memref<4x1xf32, #tpu.memory_space<vmem>>, vector<4x1xf32>
    tpu.vector_store %arg4[%c0_14, %c0_15], %14 {strides = array<i32>} : memref<4x1xf32, #tpu.memory_space<vmem>>, vector<4x1xf32>,
    %c0_16 = arith.constant 0 : index
    %c0_17 = arith.constant 0 : index
    %32 = vector.load %arg5[%c0_16, %c0_17] : memref<4x1xf32, #tpu.memory_space<vmem>>, vector<4x1xf32>
    tpu.vector_store %arg5[%c0_16, %c0_17], %22 {strides = array<i32>} : memref<4x1xf32, #tpu.memory_space<vmem>>, vector<4x1xf32>,
    %c0_18 = arith.constant 0 : index
    %c0_19 = arith.constant 0 : index
    %c0_20 = arith.constant 0 : index
    %33 = vector.load %arg0[%c0_18, %c0_19, %c0_20] : memref<2x4x256xf32, #tpu.memory_space<vmem>>, vector<1x4x256xf32>
    %34 = vector.shape_cast %33 : vector<1x4x256xf32> to vector<4x256xf32>
    %35 = vector.broadcast %27 : vector<4x1xf32> to vector<4x256xf32>
    %36 = arith.mulf %34, %35 : vector<4x256xf32>
    %37 = vector.broadcast %30 : vector<4x1xf32> to vector<4x256xf32>
    %38 = arith.addf %36, %37 : vector<4x256xf32>
    %c0_21 = arith.constant 0 : index
    %c0_22 = arith.constant 0 : index
    %c0_23 = arith.constant 0 : index
    %39 = vector.load %arg3[%c0_21, %c0_22, %c0_23] : memref<2x4x256xf32, #tpu.memory_space<vmem>>, vector<1x4x256xf32>
    %40 = vector.shape_cast %39 : vector<1x4x256xf32> to vector<4x256xf32>
    %41 = vector.shape_cast %38 : vector<4x256xf32> to vector<1x4x256xf32>
    tpu.vector_store %arg3[%c0_21, %c0_22, %c0_23], %41 {strides = array<i32>} : memref<2x4x256xf32, #tpu.memory_space<vmem>>, vector<1x4x256xf32>,
    %c1_24 = arith.constant 1 : index
    %c0_25 = arith.constant 0 : index
    %c0_26 = arith.constant 0 : index
    %42 = vector.load %arg0[%c1_24, %c0_25, %c0_26] : memref<2x4x256xf32, #tpu.memory_space<vmem>>, vector<1x4x256xf32>
    %43 = vector.shape_cast %42 : vector<1x4x256xf32> to vector<4x256xf32>
    %44 = vector.broadcast %27 : vector<4x1xf32> to vector<4x256xf32>
    %45 = arith.mulf %43, %44 : vector<4x256xf32>
    %46 = vector.broadcast %30 : vector<4x1xf32> to vector<4x256xf32>
    %47 = arith.addf %45, %46 : vector<4x256xf32>
    %c1_27 = arith.constant 1 : index
    %c0_28 = arith.constant 0 : index
    %c0_29 = arith.constant 0 : index
    %48 = vector.load %arg3[%c1_27, %c0_28, %c0_29] : memref<2x4x256xf32, #tpu.memory_space<vmem>>, vector<1x4x256xf32>
    %49 = vector.shape_cast %48 : vector<1x4x256xf32> to vector<4x256xf32>
    %50 = vector.shape_cast %47 : vector<4x256xf32> to vector<1x4x256xf32>
    tpu.vector_store %arg3[%c1_27, %c0_28, %c0_29], %50 {strides = array<i32>} : memref<2x4x256xf32, #tpu.memory_space<vmem>>, vector<1x4x256xf32>,
    return
  }
}

</mosaic_0001>

<bundles_post_ra>
// kernel: batch_norm_forward.1
= control target key start
LH: loop header
LB: loop body
LE: loop exit
PB: predicated region body
PF: predicated region fallthrough
CT: control target
= control target key end

     0   :  { %vm29_vm0 = vcmask 1043456   ;;  %v113_v14 = vmov 0   ;;  %vm56_vm1 = vcmask 3072   ;;  %v114_v29 = vmov 839922192   ;;  %s169_s0 = inlined_call_operand.vmem [shape: f32[2,4,256], index: 0, kind: input, shape index: {}]   ;;  %s170_s4 = inlined_call_operand.vmem [shape: f32[4,1], index: 4, kind: output, shape index: {1}]   ;;  %s171_s5 = inlined_call_operand.vmem [shape: f32[4,1], index: 5, kind: output, shape index: {2}]   ;;  %s172_s1 = inlined_call_operand.vmem [shape: f32[4,1], index: 1, kind: input, shape index: {}]   ;;  %s173_s2 = inlined_call_operand.vmem [shape: f32[4,1], index: 2, kind: input, shape index: {}]   ;;  %s174_s3 = inlined_call_operand.vmem [shape: f32[2,4,256], index: 3, kind: output, shape index: {0}]  }
   0x1   :  { %v17_v0 = vld [vmem:[%s169_s0] sm:$0xff]  ;;  %v104_v1 = vld [vmem:[%s169_s0 + $0x8] sm:$0xff]  ;;  %109 = vset.pattern.permute.xlu1 %v113_v14  ;;  %110 = vset.pattern.permute.xlu0 %v113_v14  ;;  %v65_v30 = vunpack.c.l.s4 %v114_v29  ;;  %v67_v31 = vlaneseq }
   0x2   :  { %v23_v2 = vadd.f32 %v104_v1, %v17_v0  ;;  %v24_v3 = vmul.f32 %v104_v1, %v104_v1  ;;  %v19_v4 = vmul.f32 %v17_v0, %v17_v0  ;;  %v49_v23 = vld [vmem:[%s172_s1] sm:$0xf] }
   0x3   :  { %v53_v26 = vld [vmem:[%s173_s2] sm:$0xf]  ;;  %v66_v32 = vunpack.c.0.s8 %v65_v30  ;;  %v68_v33 = vshrl.u32 %v67_v31, 7 }
   0x4   :  { %v27_v5 = vcombine.high %v23_v2, %v23_v2  ;;  %v30_v6 = vsel %vm29_vm0, %v23_v2, 0.0  ;;  %v25_v7 = vadd.f32 %v24_v3, %v19_v4 }
   0x5   :  { %v69_v34 = vsub.s32 %v66_v32, %v68_v33 }
   0x6   :  { %v31_v8 = vsel %vm29_vm0, %v27_v5, 0.0  ;;  %v38_v9 = vcombine.high %v25_v7, %v25_v7  ;;  %v40_v10 = vsel %vm29_vm0, %v25_v7, 0.0 }
   0x7   :  { %v32_v11 = vadd.f32 %v31_v8, %v30_v6 }
   0x8   :  { %v41_v12 = vsel %vm29_vm0, %v38_v9, 0.0 }
   0x9   :  { %33 = vadd.xlane.f32.xlu0 %v32_v11  ;;  %v42_v13 = vadd.f32 %v41_v12, %v40_v10 }
   0xd   :  { %43 = vadd.xlane.f32.xlu0 %v42_v13 }
  0x96   :  { %v34_v15 = vpop.xlane.xlu0 %33 }
  0x97   :  { %v36_v16 = vmul.f32 0.001953125, %v34_v15 }
  0x99   :  { %57 = vst.msk [vmem:[%s170_s4] sm:$0xf] %vm56_vm1, %v36_v16  ;;  %v46_v18 = vmul.f32 %v36_v16, %v36_v16 }
  0x9a   :  { %v44_v17 = vpop.xlane.xlu0 %43 }
  0x9b   :  { %v45_v19 = vmul.f32 0.001953125, %v44_v17 }
  0x9d   :  { %v47_v20 = vsub.f32 %v45_v19, %v46_v18 }
  0x9f   :  { %v48_v21 = vmax.f32 %v47_v20, 0.0 }
  0xa1   :  { %v50_v22 = vadd.f32 1e-05, %v48_v21  ;;  %58 = vst.msk [vmem:[%s171_s5] sm:$0xf] %vm56_vm1, %v48_v21 }
  0xa3   :  { %111 = vrsqrt.f32 %v50_v22 }
  0xad   :  { %v112_v24 = vpop.eup %111 }
  0xae   :  { %v52_v25 = vmul.f32 %v112_v24, %v49_v23 }
  0xb0   :  { %62 = vperm.xlu1 %109, %v52_v25   ;;  %v54_v27 = vmul.f32 %v52_v25, %v36_v16 }
  0xb2   :  { %v55_v28 = vsub.f32 %v53_v26, %v54_v27 }
  0xb4   :  { %75 = vperm.xlu1 %109, %v55_v28  }
 0x12f   :  { %v63_v35 = vpop.permute.xlu1 %62 }
 0x130   :  { %v70_v36 = vrot.slane %v63_v35, %v69_v34 }
 0x132   :  { %v72_v38 = vmul.f32 %v70_v36, %v17_v0  ;;  %v88_v39 = vmul.f32 %v104_v1, %v70_v36 }
 0x133   :  { %v76_v37 = vpop.permute.xlu1 %75 }
 0x134   :  { %v83_v40 = vrot.slane %v76_v37, %v69_v34 }
 0x136   :  { %v85_v41 = vadd.f32 %v83_v40, %v72_v38  ;;  %v89_v42 = vadd.f32 %v88_v39, %v83_v40 }
 0x138   :  { %86 = vst [vmem:[%s174_s3] sm:$0xff] %v85_v41  ;;  %106 = vst [vmem:[%s174_s3 + $0x8] sm:$0xff] %v89_v42 }

</bundles_post_ra>
